<compile_context>
chip_gen: v7x
topology: tpu7x:2x2x1
jax: 0.10.0
libtpu: 0.0.40
codegen_flags: <defaults>
</compile_context>

<pallas_src>
import jax
import jax.numpy as jnp
from jax.experimental import pallas as pl
from jax.experimental.pallas import tpu as pltpu


def _round_up(n, m):
    return ((n + m - 1) // m) * m


def _discriminator_kernel(xt_ref, w1t_ref, w2t_ref, b2_ref, ot_ref):
    # xt_ref : (D+1, TB) stream dtype -- batch on the lane axis, last row = 1.0
    # w1t_ref: (H, D+1)  stream dtype -- [W1^T | b1], resident across grid steps
    # w2t_ref: (8, H)    stream dtype -- row 0 = w2^T, rows 1..7 = 0, resident
    # b2_ref : (1, 1)    f32 scalar in SMEM
    # ot_ref : (1, TB)   f32 -- lane-dense output block

    # Layer 1 (+ folded bias): bf16 MXU matmul, f32 accumulation.
    h = jnp.dot(w1t_ref[...], xt_ref[...], preferred_element_type=jnp.float32)
    h = jnp.maximum(h, 0.0)                        # ReLU: the only big VALU work

    # Layer 2 on the MXU (sublane-padded M=8 LHS; only row 0 is meaningful).
    z = jnp.dot(w2t_ref[...], h.astype(w2t_ref.dtype),
                preferred_element_type=jnp.float32)        # (8, TB)
    z = z[0:1, :] + b2_ref[0, 0]                   # scalar bias from SMEM
    ot_ref[...] = jax.nn.sigmoid(z).astype(ot_ref.dtype)


def discriminator_forward(x, w1, b1, w2, b2, *, block_b=16384,
                          matmul_dtype=jnp.bfloat16):
    """x: (B, input_dim) -> (B, 1) float32.  Same math as the nn.Module
    (matmul operands streamed in `matmul_dtype`; pass jnp.float32 for exact
    full-precision semantics)."""
    B, D = x.shape
    H = w1.shape[1]                    # 128
    assert w1.shape == (D, H) and b1.shape == (H,)
    assert w2.shape == (H, 1) and b2.shape == (1,)
    Dp1 = D + 1
    itemsize = jnp.dtype(matmul_dtype).itemsize

    # ---- Batch-tile selection (VMEM budget + >=2 grid steps) -------------
    # Per-column bytes: double-buffered x^T block + f32 hidden activation +
    # its matmul_dtype copy for the second MXU pass + double-buffered output.
    bytes_per_col = 2 * itemsize * Dp1 + 4 * H + itemsize * H + 2 * 4
    tile_budget = 20 * 1024 * 1024     # headroom inside v7x's 64 MiB physical VMEM
    tb_cap = max(128, (tile_budget // bytes_per_col) // 128 * 128)

    bp_min = _round_up(B, 128)         # lane-aligned padded batch
    TB = min(_round_up(block_b, 128), tb_cap, bp_min)
    if bp_min >= 256:                  # guarantee >=2 tiles so both v7x TCs work
        TB = min(TB, _round_up(bp_min // 2, 128))
    Bp = _round_up(B, TB)
    num_tiles = Bp // TB

    # Explicit VMEM limit from the same budget (default scoped limit is only
    # 16/32 MiB; larger tiles / larger D would otherwise fail or spill).
    resident_bytes = (H * Dp1 + 8 * H) * itemsize
    vmem_limit = int(min(40 * 1024 * 1024,
                         max(32 * 1024 * 1024,
                             2 * (TB * bytes_per_col + resident_bytes))))

    # ---- Wrapper-side operand prep (single fused pass over x) ------------
    # Batch on the lane (minor) axis; a constant 1.0 row folds b1 into the
    # first matmul.  TODO(synk): produce x pre-transposed/cast upstream so
    # this HBM pass disappears.
    xt = jnp.concatenate([x.T, jnp.ones((1, B), x.dtype)],
                         axis=0).astype(matmul_dtype)            # (D+1, B)
    if Bp != B:
        xt = jnp.pad(xt, ((0, 0), (0, Bp - B)))                  # zero-pad tail

    w1t_aug = jnp.concatenate([w1.T, b1.reshape(H, 1)],
                              axis=1).astype(matmul_dtype)       # (H, D+1)
    w2t_pad = jnp.zeros((8, H), matmul_dtype).at[0, :].set(
        w2[:, 0].astype(matmul_dtype))                           # (8, H)
    b2s = b2.reshape(1, 1).astype(jnp.float32)                   # (1, 1) -> SMEM

    out_t = pl.pallas_call(
        _discriminator_kernel,
        out_shape=jax.ShapeDtypeStruct((1, Bp), jnp.float32),
        grid_spec=pltpu.PrefetchScalarGridSpec(
            num_scalar_prefetch=0,
            grid=(num_tiles,),
            in_specs=[
                pl.BlockSpec((Dp1, TB), lambda i: (0, i)),   # x^T tile (streamed)
                pl.BlockSpec((H, Dp1), lambda i: (0, 0)),    # [W1^T | b1] (resident)
                pl.BlockSpec((8, H), lambda i: (0, 0)),      # padded w2^T (resident)
                pl.BlockSpec(memory_space=pltpu.MemorySpace.SMEM),  # b2 scalar
            ],
            out_specs=pl.BlockSpec((1, TB), lambda i: (0, i)),
        ),
        compiler_params=pltpu.CompilerParams(
            dimension_semantics=("parallel",),   # batch tiles shard across TCs (v7x)
            vmem_limit_bytes=vmem_limit,
        ),
    )(xt, w1t_aug, w2t_pad, b2s)

    return out_t[0, :B].reshape(B, 1)


def init_params(input_dim, hidden=128, key=None):
    """Deterministic synthetic params matching nn.Linear default-init ranges."""
    if key is None:
        key = jax.random.PRNGKey(0)
    k1, k2, k3, k4 = jax.random.split(key, 4)
    bound1 = 1.0 / jnp.sqrt(input_dim)
    bound2 = 1.0 / jnp.sqrt(hidden)
    w1 = jax.random.uniform(k1, (input_dim, hidden), jnp.float32, -bound1, bound1)
    b1 = jax.random.uniform(k2, (hidden,), jnp.float32, -bound1, bound1)
    w2 = jax.random.uniform(k3, (hidden, 1), jnp.float32, -bound2, bound2)
    b2 = jax.random.uniform(k4, (1,), jnp.float32, -bound2, bound2)
    return w1, b1, w2, b2


if __name__ == "__main__":
    key = jax.random.PRNGKey(0)
    k_x, k_p = jax.random.split(key)

    B, input_dim = 8, 32
    x = jax.random.normal(k_x, (B, input_dim), jnp.float32)
    w1, b1, w2, b2 = init_params(input_dim, key=k_p)

    out = discriminator_forward(x, w1, b1, w2, b2)
    out = jax.block_until_ready(out)
    assert out.shape == (B, 1)

    # Reference 1: full-f32 nn.Module semantics (loose tolerance vs bf16 streaming).
    ref_f32 = jax.nn.sigmoid(jnp.maximum(x @ w1 + b1, 0.0) @ w2 + b2)

    # Reference 2: matched precision (bf16 matmul inputs incl. folded b1, bf16
    # hidden activation for the second matmul, f32 accumulation throughout).
    xa = jnp.concatenate([x, jnp.ones((B, 1), x.dtype)], axis=1).astype(jnp.bfloat16)
    w1a = jnp.concatenate([w1, b1.reshape(1, -1)], axis=0).astype(jnp.bfloat16)
    h_ref = jnp.maximum(jnp.dot(xa, w1a, preferred_element_type=jnp.float32), 0.0)
    z_ref = jnp.dot(h_ref.astype(jnp.bfloat16), w2.astype(jnp.bfloat16),
                    preferred_element_type=jnp.float32) + b2
    ref_matched = jax.nn.sigmoid(z_ref)

    assert jnp.allclose(out, ref_matched, atol=1e-4, rtol=1e-4)
    assert jnp.allclose(out, ref_f32, atol=5e-3, rtol=5e-3)

    print("KERNEL_OK")
</pallas_src>

<mosaic_0001>
module attributes {stable_mosaic.version = 11 : i64} {
  func.func @_discriminator_kernel(%arg0: i32, %arg1: memref<33x128xbf16, #tpu.memory_space<vmem>>, %arg2: memref<128x33xbf16, #tpu.memory_space<vmem>>, %arg3: memref<8x128xbf16, #tpu.memory_space<vmem>>, %arg4: memref<1x1xf32, #tpu.memory_space<smem>>, %arg5: memref<1x128xf32, #tpu.memory_space<vmem>>) attributes {dimension_semantics = [#tpu.dimension_semantics<parallel>], iteration_bounds = array<i64: 1>, scalar_prefetch = 0 : i64, scratch_operands = 0 : i64, tpu.core_type = #tpu.core_type<tc>, window_params = [{transform_indices = @transform_0, window_bounds = array<i64: 33, 128>}, {pipeline_mode = #tpu.pipeline_mode<synchronous>, transform_indices = @transform_1, window_bounds = array<i64: 128, 33>}, {pipeline_mode = #tpu.pipeline_mode<synchronous>, transform_indices = @transform_2, window_bounds = array<i64: 8, 128>}, {transform_indices = @transform_3, window_bounds = array<i64: 1, 1>}, {transform_indices = @transform_4, window_bounds = array<i64: 1, 128>}]} {
    %c0 = arith.constant 0 : index
    %c0_0 = arith.constant 0 : index
    %0 = vector.load %arg2[%c0, %c0_0] : memref<128x33xbf16, #tpu.memory_space<vmem>>, vector<128x33xbf16>
    %c0_1 = arith.constant 0 : index
    %c0_2 = arith.constant 0 : index
    %1 = vector.load %arg1[%c0_1, %c0_2] : memref<33x128xbf16, #tpu.memory_space<vmem>>, vector<33x128xbf16>
    %cst = arith.constant dense<0.000000e+00> : vector<128x128xf32>
    %2 = tpu.matmul %0, %1, %cst {dimension_numbers = #tpu.dot_dimension_numbers<[1], [0], [0], [1], [0, 0, 1, 1], [], []>} : vector<128x33xbf16>, vector<33x128xbf16>, vector<128x128xf32> -> vector<128x128xf32>
    %cst_3 = arith.constant 0.000000e+00 : f32
    %3 = vector.broadcast %cst_3 : f32 to vector<128x128xf32>
    %4 = arith.maximumf %2, %3 : vector<128x128xf32>
    %c0_4 = arith.constant 0 : index
    %c0_5 = arith.constant 0 : index
    %5 = vector.load %arg3[%c0_4, %c0_5] : memref<8x128xbf16, #tpu.memory_space<vmem>>, vector<8x128xbf16>
    %6 = arith.truncf %4 : vector<128x128xf32> to vector<128x128xbf16>
    %cst_6 = arith.constant dense<0.000000e+00> : vector<8x128xf32>
    %7 = tpu.matmul %5, %6, %cst_6 {dimension_numbers = #tpu.dot_dimension_numbers<[1], [0], [0], [1], [0, 0, 1, 1], [], []>} : vector<8x128xbf16>, vector<128x128xbf16>, vector<8x128xf32> -> vector<8x128xf32>
    %8 = vector.extract_strided_slice %7 {offsets = [0, 0], sizes = [1, 128], strides = [1, 1]} : vector<8x128xf32> to vector<1x128xf32>
    %c0_7 = arith.constant 0 : index
    %c0_8 = arith.constant 0 : index
    %9 = memref.load %arg4[%c0_7, %c0_8] : memref<1x1xf32, #tpu.memory_space<smem>>
    %10 = vector.broadcast %9 : f32 to vector<1x128xf32>
    %11 = arith.addf %8, %10 : vector<1x128xf32>
    %12 = arith.negf %11 : vector<1x128xf32>
    %13 = math.exp %12 : vector<1x128xf32>
    %cst_9 = arith.constant 1.000000e+00 : f32
    %14 = vector.broadcast %cst_9 : f32 to vector<1x128xf32>
    %15 = arith.addf %14, %13 : vector<1x128xf32>
    %16 = arith.divf %14, %15 : vector<1x128xf32>
    %c0_10 = arith.constant 0 : index
    %c0_11 = arith.constant 0 : index
    %17 = vector.load %arg5[%c0_10, %c0_11] : memref<1x128xf32, #tpu.memory_space<vmem>>, vector<1x128xf32>
    tpu.vector_store %arg5[%c0_10, %c0_11], %16 {strides = array<i32>} : memref<1x128xf32, #tpu.memory_space<vmem>>, vector<1x128xf32>,
    return
  }
  func.func @transform_0(%arg0: i32) -> (i32, i32) {
    %c0_i32 = arith.constant 0 : i32
    %c0_i32_0 = arith.constant 0 : i32
    return %c0_i32, %arg0 : i32, i32
  }
  func.func @transform_1(%arg0: i32) -> (i32, i32) {
    %c0_i32 = arith.constant 0 : i32
    %c0_i32_0 = arith.constant 0 : i32
    %c0_i32_1 = arith.constant 0 : i32
    return %c0_i32, %c0_i32_0 : i32, i32
  }
  func.func @transform_2(%arg0: i32) -> (i32, i32) {
    %c0_i32 = arith.constant 0 : i32
    %c0_i32_0 = arith.constant 0 : i32
    %c0_i32_1 = arith.constant 0 : i32
    return %c0_i32, %c0_i32_0 : i32, i32
  }
  func.func @transform_3(%arg0: i32) -> (i32, i32) {
    %c0_i32 = arith.constant 0 : i32
    %c0_i32_0 = arith.constant 0 : i32
    %c0_i32_1 = arith.constant 0 : i32
    return %c0_i32, %c0_i32_0 : i32, i32
  }
  func.func @transform_4(%arg0: i32) -> (i32, i32) {
    %c0_i32 = arith.constant 0 : i32
    %c0_i32_0 = arith.constant 0 : i32
    return %c0_i32, %arg0 : i32, i32
  }
}

</mosaic_0001>

<bundles_post_ra>
// kernel: tpu_custom_call.1
= control target key start
LH: loop header
LB: loop body
LE: loop exit
PB: predicated region body
PF: predicated region fallthrough
CT: control target
= control target key end

     0   :  { %vm121_vm0 = vcmask 1040384   ;;  %v438_v3 = vmov 0   ;;  %vm96_vm1 = vcmask 269312   ;;  %s526_s0 = inlined_call_operand.vmem [shape: bf16[33,128], index: 0, kind: input, shape index: {}]   ;;  %s527_s1 = inlined_call_operand.vmem [shape: bf16[128,33], index: 1, kind: input, shape index: {}]   ;;  %s528_s2 = inlined_call_operand.vmem [shape: bf16[8,128], index: 2, kind: input, shape index: {}]   ;;  %s529_s3 = inlined_call_operand.<no memory space> [shape: f32[1,1], index: 3, kind: input, shape index: {}]   ;;  %s530_s4 = inlined_call_operand.hbm [shape: f32[1,128], index: 4, kind: output, shape index: {}]  }
   0x1   :  { %v399_v0 = vld [vmem:[%s526_s0] sm:$0xff]   ;;  %v400_v1 = vld [vmem:[%s526_s0 + $0x8] sm:$0xff]   ;;  %v401_v2 = vld [vmem:[%s526_s0 + $0x10] ss:$0 sps:$4 sm:$0x11]   ;;  %v123_v4 = vsel %vm121_vm0, 65535, %v438_v3 }
   0x2   :  { %353 = vmatprep.subr.bf16.mxu0 %v399_v0  ;;  %v402_v5 = vld [vmem:[%s527_s1] sm:$0xff]   ;;  %v125_v6 = vand.u32 %v401_v2, %v123_v4  ;;  %v403_v7 = vld [vmem:[%s527_s1 + $0x8] sm:$0xff]   ;;  %v404_v8 = vld [vmem:[%s527_s1 + $0x10] sm:$0xff]  }
   0x3   :  { %354 = vmatpush3.bf16.msra.mxu0 %v399_v0  ;;  %359 = vmatprep.mubr.msk.bf16.mxu0 %vm96_vm1, %v402_v5 }
   0x4   :  { %355 = vmatprep.subr.bf16.mxu0 %v400_v1 }
   0x7   :  { %356 = vmatpush3.bf16.msra.mxu0 %v400_v1 }
   0x8   :  { %357 = vmatprep.subr.bf16.mxu0 %v125_v6 }
   0xb   :  { %358 = vmatpush3.bf16.msra.mxu0 %v125_v6 }
   0xc   :  { %10 = vsyncpa [#allocation4], 0  ;;  %v405_v9 = vld [vmem:[%s527_s1 + $0x18] sm:$0xff]   ;;  %v406_v10 = vld [vmem:[%s527_s1 + $0x20] sm:$0xff]   ;;  %v439_v14 = vmov 0.0   ;;  %vm440_vm2 = vmmov 0   ;;  %v290_v56 = vstv %s529_s3 }
   0xd   :  { %v407_v11 = vld [vmem:[%s527_s1 + $0x28] sm:$0xff]   ;;  %v408_v12 = vld [vmem:[%s527_s1 + $0x30] sm:$0xff]   ;;  %v409_v13 = vld [vmem:[%s527_s1 + $0x38] sm:$0xff]   ;;  %375 = vmatprep.subr.bf16.mxu1 %v439_v14  ;;  %391 = vmatprep.mubr.msk.bf16.mxu1 %vm440_vm2, %v439_v14  ;;  %s441_s13 = smov [#allocation3]  }
   0xe   :  { %360 = vmatmul.mubr.msk.bf16.vlgmr.msra.gmra.mrb[0].mxu0 %vm96_vm1, %v403_v7  ;;  %v240_v55 = vld [vmem:[%s528_s2] sm:$0xf]  ;;  %s305_s14 = sshll.u32 %s441_s13, 4  ;;  %s306_s14 = int_to_ptr.vmem [resolvable:$true] %s305_s14 }
   0xf   :  { %363 = vmatprep.mubr.msk.bf16.mxu0 %vm96_vm1, %v404_v8  ;;  %s414_s2 = scalar_lea.vmem %s306_s14, 16  ;;  %s418_s15 = scalar_lea.vmem %s306_s14, 32 }
  0x10   :  { %p415_p0 = scmp.ne.s32.totalorder %s306_s14, %s414_s2  ;;  %p419_p1 = scmp.lt.s32.totalorder %s306_s14, %s306_s14 }
  0x11   :  { %p420_p2 = scmp.lt.s32.totalorder %s418_s15, %s414_s2 }
  0x13   :  { %p421_p3 = por %p420_p2, %p419_p1 }
  0x15   :  { %p422_p4 = pnand %p421_p3, %p415_p0 }
  0x16   :  { %364 = vmatmul.mubr.msk.bf16.gmra.mrb[4].mxu0 %vm96_vm1, %v405_v9 }
  0x17   :  { %367 = vmatprep.mubr.msk.bf16.mxu0 %vm96_vm1, %v406_v10 }
  0x1e   :  { %368 = vmatmul.mubr.msk.bf16.gmra.mrb[8].mxu0 %vm96_vm1, %v407_v11 }
  0x1f   :  { %371 = vmatprep.mubr.msk.bf16.mxu0 %vm96_vm1, %v408_v12 }
  0x26   :  { %372 = vmatmul.mubr.msk.bf16.gmra.mrb[12].mxu0 %vm96_vm1, %v409_v13 }
  0xe1   :  { %v361_v15 = vpop.f32.mrb[0].mxu0 }
  0xe2   :  { %v161_v16 = vpop.f32.mrb[1].mxu0  ;;  %v226_v18 = vmax.f32 %v361_v15, 0.0 }
  0xe3   :  { %v362_v17 = vpop.f32.mrb[2].mxu0  ;;  %v224_v21 = vmax.f32 %v161_v16, 0.0 }
  0xe4   :  { %v227_v19 = vmax.f32 %v362_v17, 0.0  ;;  %v164_v20 = vpop.f32.mrb[3].mxu0 }
  0xe5   :  { %v225_v22 = vmax.f32 %v164_v20, 0.0 }
  0xe6   :  { %v242_v23 = vpack.c.bf16 %v227_v19, %v226_v18 }
  0xe7   :  { %v241_v24 = vpack.c.bf16 %v225_v22, %v224_v21 }
  0xe9   :  { %v365_v25 = vpop.f32.mrb[4].mxu0  ;;  %376 = vmatpush3.bf16.msra.mxu1 %v241_v24 }
  0xea   :  { %v177_v26 = vpop.f32.mrb[5].mxu0  ;;  %377 = vmatprep.subr.bf16.mxu1 %v439_v14  ;;  %v230_v28 = vmax.f32 %v365_v25, 0.0 }
  0xeb   :  { %v366_v27 = vpop.f32.mrb[6].mxu0  ;;  %v228_v31 = vmax.f32 %v177_v26, 0.0 }
  0xec   :  { %v231_v29 = vmax.f32 %v366_v27, 0.0  ;;  %v180_v30 = vpop.f32.mrb[7].mxu0 }
  0xed   :  { %v229_v32 = vmax.f32 %v180_v30, 0.0  ;;  %378 = vmatpush3.bf16.msra.mxu1 %v242_v23 }
  0xee   :  { %v244_v33 = vpack.c.bf16 %v231_v29, %v230_v28  ;;  %379 = vmatprep.subr.bf16.mxu1 %v439_v14 }
  0xef   :  { %v243_v34 = vpack.c.bf16 %v229_v32, %v228_v31 }
  0xf1   :  { %v369_v35 = vpop.f32.mrb[8].mxu0  ;;  %380 = vmatpush3.bf16.msra.mxu1 %v243_v34 }
  0xf2   :  { %v193_v36 = vpop.f32.mrb[9].mxu0  ;;  %381 = vmatprep.subr.bf16.mxu1 %v439_v14  ;;  %v234_v38 = vmax.f32 %v369_v35, 0.0 }
  0xf3   :  { %v370_v37 = vpop.f32.mrb[10].mxu0  ;;  %v232_v41 = vmax.f32 %v193_v36, 0.0 }
  0xf4   :  { %v235_v39 = vmax.f32 %v370_v37, 0.0  ;;  %v196_v40 = vpop.f32.mrb[11].mxu0 }
  0xf5   :  { %v233_v42 = vmax.f32 %v196_v40, 0.0  ;;  %382 = vmatpush3.bf16.msra.mxu1 %v244_v33 }
  0xf6   :  { %v246_v43 = vpack.c.bf16 %v235_v39, %v234_v38  ;;  %383 = vmatprep.subr.bf16.mxu1 %v439_v14 }
  0xf7   :  { %v245_v44 = vpack.c.bf16 %v233_v42, %v232_v41 }
  0xf9   :  { %v373_v45 = vpop.f32.mrb[12].mxu0  ;;  %384 = vmatpush3.bf16.msra.mxu1 %v245_v44 }
  0xfa   :  { %v209_v46 = vpop.f32.mrb[13].mxu0  ;;  %385 = vmatprep.subr.bf16.mxu1 %v439_v14  ;;  %v238_v48 = vmax.f32 %v373_v45, 0.0 }
  0xfb   :  { %v374_v47 = vpop.f32.mrb[14].mxu0  ;;  %v236_v51 = vmax.f32 %v209_v46, 0.0 }
  0xfc   :  { %v239_v49 = vmax.f32 %v374_v47, 0.0  ;;  %v212_v50 = vpop.f32.mrb[15].mxu0 }
  0xfd   :  { %v237_v52 = vmax.f32 %v212_v50, 0.0  ;;  %386 = vmatpush3.bf16.msra.mxu1 %v246_v43 }
  0xfe   :  { %v248_v53 = vpack.c.bf16 %v239_v49, %v238_v48  ;;  %387 = vmatprep.subr.bf16.mxu1 %v439_v14 }
  0xff   :  { %v247_v54 = vpack.c.bf16 %v237_v52, %v236_v51 }
 0x101   :  { %388 = vmatpush3.bf16.msra.mxu1 %v247_v54 }
 0x102   :  { %389 = vmatprep.subr.bf16.mxu1 %v439_v14 }
 0x105   :  { %390 = vmatpush3.bf16.msra.mxu1 %v248_v53 }
 0x108   :  { %392 = vmatmul.mubr.bf16.vlgmr.msra.gmra.mrb[0].mxu1 %v240_v55 }
 0x1db   :  { %v283_v57 = vpop.f32.mrb[0].mxu1 }
 0x1dc   :  { %v291_v58 = vadd.f32 %v290_v56, %v283_v57  ;;  %v393_v59 = vpop.f32.mrb[1].mxu1 }
 0x1dd   :  { %v286_v60 = vpop.f32.mrb[2].mxu1 }
 0x1de   :  { %v332_v61 = vmul.f32 -1.442695, %v291_v58  ;;  %v394_v62 = vpop.f32.mrb[3].mxu1 }
 0x1e0   :  { %410 = vpow2.f32 %v332_v61 }
 0x1ea   :  { %v411_v63 = vpop.eup %410 }
 0x1eb   :  { %v295_v0 = vadd.f32 1.0, %v411_v63 }
 0x1ed   :  { %412 = vrcp.f32 %v295_v0 }
 0x1f7   :  { %v413_v1 = vpop.eup %412 }
 0x1f8   :  { %298 = vst [vmem:[#allocation3] sm:$0x1] %v413_v1 }
 0x1f9   :  { %425 = shalt.err (!%p422_p4)
}
 0x1fa   :  { %s426_s17 = scalar_lea.hbm %s530_s4, 16 }
 0x1fb   :  { %p427_p5 = scmp.ne.s32.totalorder %s530_s4, %s426_s17  ;;  %p430_p6 = scmp.lt.u32.totalorder %s426_s17, %s530_s4 }
 0x1fd   :  { %p432_p7 = pnand %p430_p6, %p427_p5 }
 0x1ff   :  { %435 = shalt.err (!%p432_p7)
}
 0x200   :  { %308 = dma.vmem_to_hbm [thread:$0]  %s306_s14, 16, %s530_s4, [#allocation4]  }
 0x201   :  { %436 = dma.done.wait [#allocation4], 16  }
 0x202   :  { %437 = vsyncadd [#allocation4], 4294967280 }
 0x203   :  { %312 = vsyncpa [#allocation4], 1 }

</bundles_post_ra>
